<compile_context>
chip_gen: v7x
topology: tpu7x:2x2x1
jax: 0.10.0
libtpu: 0.0.40
codegen_flags: <defaults>
</compile_context>

<pallas_src>
import jax
import jax.numpy as jnp
from jax.experimental import pallas as pl
from jax.experimental.pallas import tpu as pltpu

INPUT_SIZE = 784   # 1 x 28 x 28
HIDDEN = 50
NUM_CLASS = 10

H_PAD = 128        # hidden dim padded to a full lane tile
C_PAD = 128        # class dim padded to a full lane tile (lane-dense output)
TB_MAX = 2048      # batch tile rows (multiple of 8); ~6.4 MB f32 per x buffer


def mlp_kernel(x_ref, w1_ref, b1_ref, w2_ref, b2_ref, o_ref):
    # x arrives f32 straight from HBM; cast to bf16 in VMEM (free relative to
    # a wrapper-side cast, which would add a full read/write pass over x).
    x_bf = x_ref[...].astype(jnp.bfloat16)
    # fc1 + relu: bf16 inputs, f32 accumulation on the MXU.
    h = jnp.dot(x_bf, w1_ref[...], preferred_element_type=jnp.float32)
    h = jnp.maximum(h + b1_ref[...], 0.0)
    # fc2: padded hidden lanes are exactly zero (zero weights + zero bias,
    # relu(0) = 0) and padded w2 rows are zero, so they contribute nothing.
    out = jnp.dot(h.astype(jnp.bfloat16), w2_ref[...],
                  preferred_element_type=jnp.float32)
    # bf16 writeback: lane-dense (tb, 128) slab, halves output HBM traffic.
    o_ref[...] = (out + b2_ref[...]).astype(o_ref.dtype)


def prepare_params(w1, b1, w2, b2):
    """Pad/cast the weights once (call outside the per-step hot path).

    w1: (784, 50), b1: (1, 50), w2: (50, 10), b2: (1, 10)  ->  lane-padded.
    """
    w1_p = jnp.pad(w1.astype(jnp.bfloat16), ((0, 0), (0, H_PAD - HIDDEN)))
    b1_p = jnp.pad(b1.astype(jnp.float32).reshape(1, HIDDEN),
                   ((0, 0), (0, H_PAD - HIDDEN)))
    w2_p = jnp.pad(w2.astype(jnp.bfloat16),
                   ((0, H_PAD - HIDDEN), (0, C_PAD - NUM_CLASS)))
    b2_p = jnp.pad(b2.astype(jnp.float32).reshape(1, NUM_CLASS),
                   ((0, 0), (0, C_PAD - NUM_CLASS)))
    return w1_p, b1_p, w2_p, b2_p


def nn_forward_prepared(x, w1_p, b1_p, w2_p, b2_p):
    """x: (B, 1, 28, 28) or (B, 784) f32; params from prepare_params().
    Returns (B, NUM_CLASS) float32."""
    B = x.shape[0]
    x_flat = x.reshape(B, -1)                # torch.flatten(x, 1); view, no copy
    assert x_flat.shape[1] == INPUT_SIZE
    x_flat = x_flat.astype(jnp.float32)      # no-op for f32 inputs

    # Batch tile: minimize tail padding (b_pad == B whenever B splits evenly
    # into 8-row-aligned blocks, e.g. any B % 8 == 0 up to TB_MAX).
    num_blocks = pl.cdiv(B, TB_MAX)
    tb = ((pl.cdiv(B, num_blocks) + 7) // 8) * 8
    b_pad = num_blocks * tb
    if b_pad != B:
        # Only taken for ragged batches; never pads a whole extra block.
        x_flat = jnp.pad(x_flat, ((0, b_pad - B), (0, 0)))

    out_padded = pl.pallas_call(
        mlp_kernel,
        out_shape=jax.ShapeDtypeStruct((b_pad, C_PAD), jnp.bfloat16),
        grid=(num_blocks,),
        in_specs=[
            # activation stream: tiled over batch (double-buffered by Pallas)
            pl.BlockSpec((tb, INPUT_SIZE), lambda i: (i, 0)),
            # weights/biases: constant index map -> stay VMEM-resident
            pl.BlockSpec((INPUT_SIZE, H_PAD), lambda i: (0, 0)),
            pl.BlockSpec((1, H_PAD), lambda i: (0, 0)),
            pl.BlockSpec((H_PAD, C_PAD), lambda i: (0, 0)),
            pl.BlockSpec((1, C_PAD), lambda i: (0, 0)),
        ],
        out_specs=pl.BlockSpec((tb, C_PAD), lambda i: (i, 0)),
        compiler_params=pltpu.CompilerParams(
            dimension_semantics=("parallel",),       # megacore split on v7x
            vmem_limit_bytes=32 * 1024 * 1024,       # fits TB=2048 f32 x tiles
        ),
    )(x_flat, w1_p, b1_p, w2_p, b2_p)

    # Slice off pad rows/lanes; upcast bf16 logits to f32 (B x 10, negligible).
    return out_padded[:B, :NUM_CLASS].astype(jnp.float32)


def nn_forward(x, w1, b1, w2, b2):
    """Convenience wrapper that prepares params on every call."""
    return nn_forward_prepared(x, *prepare_params(w1, b1, w2, b2))


def init_params(key):
    """Deterministic init mimicking nn.Linear's U(-1/sqrt(fan_in), 1/sqrt(fan_in))."""
    k1, k2, k3, k4 = jax.random.split(key, 4)
    bound1 = 1.0 / (INPUT_SIZE ** 0.5)
    bound2 = 1.0 / (HIDDEN ** 0.5)
    # weights stored as (in, out) = PyTorch weight.T
    w1 = jax.random.uniform(k1, (INPUT_SIZE, HIDDEN), jnp.float32,
                            minval=-bound1, maxval=bound1)
    b1 = jax.random.uniform(k2, (1, HIDDEN), jnp.float32,
                            minval=-bound1, maxval=bound1)
    w2 = jax.random.uniform(k3, (HIDDEN, NUM_CLASS), jnp.float32,
                            minval=-bound2, maxval=bound2)
    b2 = jax.random.uniform(k4, (1, NUM_CLASS), jnp.float32,
                            minval=-bound2, maxval=bound2)
    return w1, b1, w2, b2


if __name__ == "__main__":
    key = jax.random.PRNGKey(0)
    k_x, k_p = jax.random.split(key)

    B = 2
    # MNIST-like NCHW input, flattened inside the wrapper (start_dim=1)
    x = jax.random.normal(k_x, (B, 1, 28, 28), jnp.float32)
    w1, b1, w2, b2 = init_params(k_p)

    # Weight prep done once, outside the hot path (per perf review).
    params_p = prepare_params(w1, b1, w2, b2)

    fwd = jax.jit(nn_forward_prepared)
    out = jax.block_until_ready(fwd(x, *params_p))
    assert out.shape == (B, NUM_CLASS)
    assert out.dtype == jnp.float32

    # Reference in plain JAX using the same bf16 inputs / f32 accumulation,
    # with the final bf16 writeback quantization applied.
    x_bf = x.reshape(B, -1).astype(jnp.bfloat16)
    h_ref = jnp.maximum(
        jnp.dot(x_bf, w1.astype(jnp.bfloat16),
                preferred_element_type=jnp.float32) + b1, 0.0)
    ref = jnp.dot(h_ref.astype(jnp.bfloat16), w2.astype(jnp.bfloat16),
                  preferred_element_type=jnp.float32) + b2
    ref_q = ref.astype(jnp.bfloat16).astype(jnp.float32)
    assert jnp.allclose(out, ref_q, atol=1e-2, rtol=1e-2)

    # Sanity vs. the full-f32 math (bf16 quantization noise only)
    x_f32 = x.reshape(B, -1)
    ref_f32 = jnp.maximum(x_f32 @ w1 + b1, 0.0) @ w2 + b2
    assert jnp.allclose(out, ref_f32, atol=5e-2, rtol=5e-2)

    print("KERNEL_OK")
</pallas_src>

<mosaic_0001>
module attributes {stable_mosaic.version = 11 : i64} {
  func.func @mlp_kernel(%arg0: i32, %arg1: memref<8x784xf32, #tpu.memory_space<vmem>>, %arg2: memref<784x128xbf16, #tpu.memory_space<vmem>>, %arg3: memref<1x128xf32, #tpu.memory_space<vmem>>, %arg4: memref<128x128xbf16, #tpu.memory_space<vmem>>, %arg5: memref<1x128xf32, #tpu.memory_space<vmem>>, %arg6: memref<8x128xbf16, #tpu.memory_space<vmem>>) attributes {dimension_semantics = [#tpu.dimension_semantics<parallel>], iteration_bounds = array<i64: 1>, scalar_prefetch = 0 : i64, scratch_operands = 0 : i64, tpu.core_type = #tpu.core_type<tc>, window_params = [{transform_indices = @transform_0, window_bounds = array<i64: 8, 784>}, {pipeline_mode = #tpu.pipeline_mode<synchronous>, transform_indices = @transform_1, window_bounds = array<i64: 784, 128>}, {pipeline_mode = #tpu.pipeline_mode<synchronous>, transform_indices = @transform_2, window_bounds = array<i64: 1, 128>}, {pipeline_mode = #tpu.pipeline_mode<synchronous>, transform_indices = @transform_3, window_bounds = array<i64: 128, 128>}, {pipeline_mode = #tpu.pipeline_mode<synchronous>, transform_indices = @transform_4, window_bounds = array<i64: 1, 128>}, {transform_indices = @transform_5, window_bounds = array<i64: 8, 128>}]} {
    %c0 = arith.constant 0 : index
    %c0_0 = arith.constant 0 : index
    %0 = vector.load %arg1[%c0, %c0_0] : memref<8x784xf32, #tpu.memory_space<vmem>>, vector<8x784xf32>
    %1 = arith.truncf %0 : vector<8x784xf32> to vector<8x784xbf16>
    %c0_1 = arith.constant 0 : index
    %c0_2 = arith.constant 0 : index
    %2 = vector.load %arg2[%c0_1, %c0_2] : memref<784x128xbf16, #tpu.memory_space<vmem>>, vector<784x128xbf16>
    %cst = arith.constant dense<0.000000e+00> : vector<8x128xf32>
    %3 = tpu.matmul %1, %2, %cst {dimension_numbers = #tpu.dot_dimension_numbers<[1], [0], [0], [1], [0, 0, 1, 1], [], []>} : vector<8x784xbf16>, vector<784x128xbf16>, vector<8x128xf32> -> vector<8x128xf32>
    %c0_3 = arith.constant 0 : index
    %c0_4 = arith.constant 0 : index
    %4 = vector.load %arg3[%c0_3, %c0_4] : memref<1x128xf32, #tpu.memory_space<vmem>>, vector<1x128xf32>
    %5 = vector.broadcast %4 : vector<1x128xf32> to vector<8x128xf32>
    %6 = arith.addf %3, %5 : vector<8x128xf32>
    %cst_5 = arith.constant 0.000000e+00 : f32
    %7 = vector.broadcast %cst_5 : f32 to vector<8x128xf32>
    %8 = arith.maximumf %6, %7 : vector<8x128xf32>
    %9 = arith.truncf %8 : vector<8x128xf32> to vector<8x128xbf16>
    %c0_6 = arith.constant 0 : index
    %c0_7 = arith.constant 0 : index
    %10 = vector.load %arg4[%c0_6, %c0_7] : memref<128x128xbf16, #tpu.memory_space<vmem>>, vector<128x128xbf16>
    %cst_8 = arith.constant dense<0.000000e+00> : vector<8x128xf32>
    %11 = tpu.matmul %9, %10, %cst_8 {dimension_numbers = #tpu.dot_dimension_numbers<[1], [0], [0], [1], [0, 0, 1, 1], [], []>} : vector<8x128xbf16>, vector<128x128xbf16>, vector<8x128xf32> -> vector<8x128xf32>
    %c0_9 = arith.constant 0 : index
    %c0_10 = arith.constant 0 : index
    %12 = vector.load %arg5[%c0_9, %c0_10] : memref<1x128xf32, #tpu.memory_space<vmem>>, vector<1x128xf32>
    %13 = vector.broadcast %12 : vector<1x128xf32> to vector<8x128xf32>
    %14 = arith.addf %11, %13 : vector<8x128xf32>
    %15 = arith.truncf %14 : vector<8x128xf32> to vector<8x128xbf16>
    %c0_11 = arith.constant 0 : index
    %c0_12 = arith.constant 0 : index
    %16 = vector.load %arg6[%c0_11, %c0_12] : memref<8x128xbf16, #tpu.memory_space<vmem>>, vector<8x128xbf16>
    tpu.vector_store %arg6[%c0_11, %c0_12], %15 {strides = array<i32>} : memref<8x128xbf16, #tpu.memory_space<vmem>>, vector<8x128xbf16>,
    return
  }
  func.func @transform_0(%arg0: i32) -> (i32, i32) {
    %c0_i32 = arith.constant 0 : i32
    %c0_i32_0 = arith.constant 0 : i32
    return %arg0, %c0_i32 : i32, i32
  }
  func.func @transform_1(%arg0: i32) -> (i32, i32) {
    %c0_i32 = arith.constant 0 : i32
    %c0_i32_0 = arith.constant 0 : i32
    %c0_i32_1 = arith.constant 0 : i32
    return %c0_i32, %c0_i32_0 : i32, i32
  }
  func.func @transform_2(%arg0: i32) -> (i32, i32) {
    %c0_i32 = arith.constant 0 : i32
    %c0_i32_0 = arith.constant 0 : i32
    %c0_i32_1 = arith.constant 0 : i32
    return %c0_i32, %c0_i32_0 : i32, i32
  }
  func.func @transform_3(%arg0: i32) -> (i32, i32) {
    %c0_i32 = arith.constant 0 : i32
    %c0_i32_0 = arith.constant 0 : i32
    %c0_i32_1 = arith.constant 0 : i32
    return %c0_i32, %c0_i32_0 : i32, i32
  }
  func.func @transform_4(%arg0: i32) -> (i32, i32) {
    %c0_i32 = arith.constant 0 : i32
    %c0_i32_0 = arith.constant 0 : i32
    %c0_i32_1 = arith.constant 0 : i32
    return %c0_i32, %c0_i32_0 : i32, i32
  }
  func.func @transform_5(%arg0: i32) -> (i32, i32) {
    %c0_i32 = arith.constant 0 : i32
    %c0_i32_0 = arith.constant 0 : i32
    return %arg0, %c0_i32 : i32, i32
  }
}

</mosaic_0001>

<bundles_post_ra>
// kernel: nn_forward_prepared.1
= control target key start
LH: loop header
LB: loop body
LE: loop exit
PB: predicated region body
PF: predicated region fallthrough
CT: control target
= control target key end

     0   :  { %10 = vsyncpa [#allocation3], 0  ;;  %s981_s18 = smov [#allocation2]   ;;  %s1095_s0 = inlined_call_operand.vmem [shape: f32[8,784], index: 0, kind: input, shape index: {}]   ;;  %s1096_s1 = inlined_call_operand.hbm [shape: bf16[784,128], index: 1, kind: input, shape index: {}]   ;;  %s1097_s2 = inlined_call_operand.vmem [shape: f32[1,128], index: 2, kind: input, shape index: {}]   ;;  %s1098_s3 = inlined_call_operand.vmem [shape: bf16[128,128], index: 3, kind: input, shape index: {}]   ;;  %s1099_s4 = inlined_call_operand.vmem [shape: f32[1,128], index: 4, kind: input, shape index: {}]   ;;  %s1100_s5 = inlined_call_operand.vmem [shape: bf16[8,128], index: 5, kind: output, shape index: {}]  }
   0x1   :  { %s18_s19 = sshll.u32 %s981_s18, 4  ;;  %s957_s22 = scalar_lea.hbm %s1096_s1, 6272  ;;  %s19_s19 = int_to_ptr.vmem [resolvable:$true] %s18_s19 }
   0x2   :  { %p958_p0 = scmp.ne.s32.totalorder %s1096_s1, %s957_s22  ;;  %p961_p1 = scmp.lt.u32.totalorder %s957_s22, %s1096_s1 }
   0x4   :  { %p963_p2 = pnand %p961_p1, %p958_p0 }
   0x6   :  { %966 = shalt.err (!%p963_p2)
}
   0x7   :  { %s967_s27 = scalar_lea.vmem %s19_s19, 6272  ;;  %p972_p4 = scmp.lt.s32.totalorder %s19_s19, %s19_s19 }
   0x8   :  { %p968_p3 = scmp.ne.s32.totalorder %s19_s19, %s967_s27  ;;  %p973_p5 = scmp.lt.s32.totalorder %s967_s27, %s967_s27 }
   0xa   :  { %p974_p6 = por %p973_p5, %p972_p4 }
   0xc   :  { %p975_p7 = pnand %p974_p6, %p968_p3 }
   0xe   :  { %978 = shalt.err (!%p975_p7)
}
   0xf   :  { %s982_s28 = smov 64   ;;  %s983_s29 = smov 4  }
  0x10   :  { %24 = dma.hbm_to_vmem [thread:$0]  %s1096_s1, 6272, %s19_s19, [#allocation3], %s982_s28, %s982_s28, %s983_s29  }
  0x11   :  { %979 = dma.done.wait [#allocation3], 6272  }
  0x12   :  { %980 = vsyncadd [#allocation3], 4294961024  ;;  %v900_v0 = vld [vmem:[#allocation2 + $0x40] sm:$0xff]   ;;  %v904_v4 = vld [vmem:[#allocation2 + $0x48] sm:$0xff]   ;;  %v984_v44 = vmov 0.0   ;;  %vm985_vm0 = vmmov 0  }
  0x13   :  { %v901_v1 = vld [vmem:[#allocation2] sm:$0xff]   ;;  %792 = vmatprep.subr.bf16.mxu0 %v900_v0  ;;  %v905_v5 = vld [vmem:[#allocation2 + $0x8] sm:$0xff]   ;;  %v908_v8 = vld [vmem:[#allocation2 + $0x50] sm:$0xff]   ;;  %vm448_vm1 = vcmask 130048  }
  0x14   :  { %v902_v2 = vld [vmem:[#allocation2 + $0xc0] sm:$0xff]   ;;  %793 = vmatpush3.bf16.msra.mxu0 %v901_v1  ;;  %v906_v6 = vld [vmem:[#allocation2 + $0xc8] sm:$0xff]   ;;  %v909_v9 = vld [vmem:[#allocation2 + $0x10] sm:$0xff]  }
  0x15   :  { %v903_v3 = vld [vmem:[#allocation2 + $0x80] sm:$0xff]   ;;  %814 = vmatprep.subr.bf16.mxu1 %v902_v2  ;;  %794 = vmatprep.subr.bf16.mxu0 %v904_v4  ;;  %v907_v7 = vld [vmem:[#allocation2 + $0x88] sm:$0xff]   ;;  %v910_v10 = vld [vmem:[#allocation2 + $0xd0] sm:$0xff]  }
  0x16   :  { %815 = vmatpush3.bf16.msra.mxu1 %v903_v3  ;;  %v911_v11 = vld [vmem:[#allocation2 + $0x90] sm:$0xff]   ;;  %v912_v12 = vld [vmem:[#allocation2 + $0x58] sm:$0xff]   ;;  %v916_v16 = vld [vmem:[#allocation2 + $0x60] sm:$0xff]  }
  0x17   :  { %816 = vmatprep.subr.bf16.mxu1 %v906_v6  ;;  %v913_v13 = vld [vmem:[#allocation2 + $0x18] sm:$0xff]   ;;  %v917_v17 = vld [vmem:[#allocation2 + $0x20] sm:$0xff]   ;;  %v920_v20 = vld [vmem:[#allocation2 + $0x68] sm:$0xff]  }
  0x18   :  { %795 = vmatpush3.bf16.msra.mxu0 %v905_v5  ;;  %v914_v14 = vld [vmem:[#allocation2 + $0xd8] sm:$0xff]   ;;  %v918_v18 = vld [vmem:[#allocation2 + $0xe0] sm:$0xff]   ;;  %v921_v21 = vld [vmem:[#allocation2 + $0x28] sm:$0xff]  }
  0x19   :  { %796 = vmatprep.subr.bf16.mxu0 %v908_v8  ;;  %v915_v15 = vld [vmem:[#allocation2 + $0x98] sm:$0xff]   ;;  %v919_v19 = vld [vmem:[#allocation2 + $0xa0] sm:$0xff]   ;;  %v922_v22 = vld [vmem:[#allocation2 + $0xe8] sm:$0xff]  }
  0x1a   :  { %817 = vmatpush3.bf16.msra.mxu1 %v907_v7  ;;  %v923_v23 = vld [vmem:[#allocation2 + $0xa8] sm:$0xff]   ;;  %v924_v24 = vld [vmem:[#allocation2 + $0x70] sm:$0xff]   ;;  %v928_v28 = vld [vmem:[#allocation2 + $0x78] sm:$0xff]  }
  0x1b   :  { %818 = vmatprep.subr.bf16.mxu1 %v910_v10  ;;  %v925_v25 = vld [vmem:[#allocation2 + $0x30] sm:$0xff]   ;;  %v929_v29 = vld [vmem:[#allocation2 + $0x38] sm:$0xff]   ;;  %v36_v31 = vld [vmem:[%s1095_s0 + $0x8] sm:$0xff] }
  0x1c   :  { %797 = vmatpush3.bf16.msra.mxu0 %v909_v9  ;;  %v926_v26 = vld [vmem:[#allocation2 + $0xf0] sm:$0xff]   ;;  %v930_v30 = vld [vmem:[#allocation2 + $0xf8] sm:$0xff]   ;;  %v43_v32 = vpack.c.bf16 %v36_v31, %v36_v31  ;;  %v35_v34 = vld [vmem:[%s1095_s0] sm:$0xff] }
  0x1d   :  { %798 = vmatprep.subr.bf16.mxu0 %v912_v12  ;;  %v927_v27 = vld [vmem:[#allocation2 + $0xb0] sm:$0xff]   ;;  %v931_v33 = vld [vmem:[#allocation2 + $0xb8] sm:$0xff]   ;;  %v42_v35 = vpack.c.bf16 %v35_v34, %v35_v34  ;;  %v932_v36 = vld [vmem:[#allocation2 + $0x140] sm:$0xff]  }
  0x1e   :  { %819 = vmatpush3.bf16.msra.mxu1 %v911_v11  ;;  %v38_v37 = vld [vmem:[%s1095_s0 + $0x18] sm:$0xff]  ;;  %484 = vmatprep.mubr.bf16.mxu0 %v43_v32  ;;  %v933_v39 = vld [vmem:[#allocation2 + $0x100] sm:$0xff]   ;;  %v37_v40 = vld [vmem:[%s1095_s0 + $0x10] sm:$0xff] }
  0x1f   :  { %820 = vmatprep.subr.bf16.mxu1 %v914_v14  ;;  %v45_v38 = vpack.c.bf16 %v38_v37, %v38_v37  ;;  %v44_v41 = vpack.c.bf16 %v37_v40, %v37_v40  ;;  %v934_v42 = vld [vmem:[#allocation2 + $0x148] sm:$0xff]   ;;  %v936_v45 = vld [vmem:[#allocation2 + $0x150] sm:$0xff]   ;;  %v938_v47 = vld [vmem:[#allocation2 + $0x158] sm:$0xff]  }
  0x20   :  { %799 = vmatpush3.bf16.msra.mxu0 %v913_v13  ;;  %v935_v43 = vld [vmem:[#allocation2 + $0x108] sm:$0xff]   ;;  %v937_v46 = vld [vmem:[#allocation2 + $0x110] sm:$0xff]   ;;  %v939_v48 = vld [vmem:[#allocation2 + $0x118] sm:$0xff]  }
  0x21   :  { %800 = vmatprep.subr.bf16.mxu0 %v916_v16  ;;  %524 = vmatprep.mubr.bf16.mxu1 %v45_v38  ;;  %v940_v49 = vld [vmem:[#allocation2 + $0x160] sm:$0xff]   ;;  %v942_v51 = vld [vmem:[#allocation2 + $0x168] sm:$0xff]   ;;  %v944_v55 = vld [vmem:[#allocation2 + $0x170] sm:$0xff]  }
  0x22   :  { %821 = vmatpush3.bf16.msra.mxu1 %v915_v15  ;;  %v941_v50 = vld [vmem:[#allocation2 + $0x120] sm:$0xff]   ;;  %v943_v52 = vld [vmem:[#allocation2 + $0x128] sm:$0xff]   ;;  %v41_v57 = vld [vmem:[%s1095_s0 + $0x30] sm:$0xff] }
  0x23   :  { %822 = vmatprep.subr.bf16.mxu1 %v918_v18  ;;  %v948_v53 = vld [vmem:[#allocation2 + $0x180] sm:$0xff]   ;;  %v40_v54 = vld [vmem:[%s1095_s0 + $0x28] sm:$0xff]  ;;  %v48_v58 = vpack.c.bf16 %v41_v57, %v41_v57  ;;  %v945_v59 = vld [vmem:[#allocation2 + $0x130] sm:$0xff]  }
  0x24   :  { %801 = vmatpush3.bf16.msra.mxu0 %v917_v17  ;;  %v47_v56 = vpack.c.bf16 %v40_v54, %v40_v54  ;;  %v946_v60 = vld [vmem:[#allocation2 + $0x178] sm:$0xff]   ;;  %v39_v62 = vld [vmem:[%s1095_s0 + $0x20] sm:$0xff]  ;;  %v950_v1 = vld [vmem:[%s1098_s3 + $0x8] sm:$0xff]  }
  0x25   :  { %802 = vmatprep.subr.bf16.mxu0 %v920_v20  ;;  %v947_v61 = vld [vmem:[#allocation2 + $0x138] sm:$0xff]   ;;  %v46_v63 = vpack.c.bf16 %v39_v62, %v39_v62  ;;  %v949_v0 = vld [vmem:[%s1098_s3] sm:$0xff]   ;;  %v951_v2 = vld [vmem:[%s1098_s3 + $0x10] sm:$0xff]  }
  0x26   :  { %823 = vmatpush3.bf16.msra.mxu1 %v919_v19  ;;  %v952_v3 = vld [vmem:[%s1098_s3 + $0x18] sm:$0xff]   ;;  %v953_v4 = vld [vmem:[%s1098_s3 + $0x20] sm:$0xff]   ;;  %v954_v5 = vld [vmem:[%s1098_s3 + $0x28] sm:$0xff]  }
  0x27   :  { %824 = vmatprep.subr.bf16.mxu1 %v922_v22  ;;  %v955_v6 = vld [vmem:[%s1098_s3 + $0x30] sm:$0xff]   ;;  %v956_v7 = vld [vmem:[%s1098_s3 + $0x38] sm:$0xff]   ;;  %v732_v9 = vld [vmem:[%s1097_s2] ss:$0 sm:$0xff] }
  0x28   :  { %803 = vmatpush3.bf16.msra.mxu0 %v921_v21  ;;  %v783_v34 = vld [vmem:[%s1099_s4] ss:$0 sm:$0xff] }
  0x29   :  { %804 = vmatprep.subr.bf16.mxu0 %v924_v24 }
  0x2a   :  { %825 = vmatpush3.bf16.msra.mxu1 %v923_v23 }
  0x2b   :  { %826 = vmatprep.subr.bf16.mxu1 %v926_v26 }
  0x2c   :  { %805 = vmatpush3.bf16.msra.mxu0 %v925_v25 }
  0x2d   :  { %806 = vmatprep.subr.bf16.mxu0 %v928_v28 }
  0x2e   :  { %827 = vmatpush3.bf16.msra.mxu1 %v927_v27 }
  0x2f   :  { %828 = vmatprep.subr.bf16.mxu1 %v930_v30 }
  0x30   :  { %807 = vmatpush3.bf16.msra.mxu0 %v929_v29 }
  0x31   :  { %836 = vmatprep.subr.bf16.mxu0 %v932_v36 }
  0x32   :  { %829 = vmatpush3.bf16.msra.mxu1 %v931_v33 }
  0x33   :  { %485 = vmatmul.mubr.bf16.vlgmr.msra.gmra.mrb[0].mxu0 %v42_v35  ;;  %869 = vmatprep.subr.bf16.mxu1 %v984_v44 }
  0x34   :  { %837 = vmatpush3.bf16.msra.mxu0 %v933_v39  ;;  %564 = vmatprep.mubr.bf16.mxu0 %v47_v56 }
  0x35   :  { %525 = vmatmul.mubr.bf16.vlgmr.msra.gmra.mrb[0].mxu1 %v44_v41  ;;  %838 = vmatprep.subr.bf16.mxu0 %v934_v42 }
  0x36   :  { %871 = vmatprep.mubr.msk.bf16.mxu1 %vm985_vm0, %v984_v44  ;;  %870 = vmatpush3.bf16.msra.mxu1 %v948_v53 }
  0x37   :  { %875 = vmatprep.subr.bf16.mxu1 %v984_v44 }
  0x38   :  { %839 = vmatpush3.bf16.msra.mxu0 %v935_v43 }
  0x39   :  { %840 = vmatprep.subr.bf16.mxu0 %v936_v45 }
  0x3c   :  { %841 = vmatpush3.bf16.msra.mxu0 %v937_v46 }
  0x3d   :  { %842 = vmatprep.subr.bf16.mxu0 %v938_v47  ;;  %872 = vmatmul.mubr.msk.bf16.vlgmr.msra.gmra.mrb[4].mxu1 %vm448_vm1, %v48_v58 }
  0x3e   :  { %891 = vmatprep.mubr.msk.bf16.mxu1 %vm985_vm0, %v984_v44  ;;  %876 = vmatpush3.bf16.msra.mxu1 %v949_v0 }
  0x3f   :  { %877 = vmatprep.subr.bf16.mxu1 %v984_v44 }
  0x40   :  { %843 = vmatpush3.bf16.msra.mxu0 %v939_v48 }
  0x41   :  { %844 = vmatprep.subr.bf16.mxu0 %v940_v49 }
  0x42   :  { %878 = vmatpush3.bf16.msra.mxu1 %v950_v1 }
  0x43   :  { %879 = vmatprep.subr.bf16.mxu1 %v984_v44 }
  0x44   :  { %845 = vmatpush3.bf16.msra.mxu0 %v941_v50 }
  0x45   :  { %846 = vmatprep.subr.bf16.mxu0 %v942_v51 }
  0x46   :  { %880 = vmatpush3.bf16.msra.mxu1 %v951_v2 }
  0x47   :  { %881 = vmatprep.subr.bf16.mxu1 %v984_v44 }
  0x48   :  { %847 = vmatpush3.bf16.msra.mxu0 %v943_v52 }
  0x49   :  { %848 = vmatprep.subr.bf16.mxu0 %v944_v55 }
  0x4a   :  { %882 = vmatpush3.bf16.msra.mxu1 %v952_v3 }
  0x4b   :  { %883 = vmatprep.subr.bf16.mxu1 %v984_v44 }
  0x4c   :  { %849 = vmatpush3.bf16.msra.mxu0 %v945_v59 }
  0x4d   :  { %850 = vmatprep.subr.bf16.mxu0 %v946_v60 }
  0x4e   :  { %884 = vmatpush3.bf16.msra.mxu1 %v953_v4 }
  0x4f   :  { %885 = vmatprep.subr.bf16.mxu1 %v984_v44 }
  0x50   :  { %851 = vmatpush3.bf16.msra.mxu0 %v947_v61 }
  0x52   :  { %886 = vmatpush3.bf16.msra.mxu1 %v954_v5 }
  0x53   :  { %565 = vmatmul.mubr.bf16.vlgmr.msra.gmra.mrb[4].mxu0 %v46_v63  ;;  %887 = vmatprep.subr.bf16.mxu1 %v984_v44 }
  0x56   :  { %888 = vmatpush3.bf16.msra.mxu1 %v955_v6 }
  0x57   :  { %889 = vmatprep.subr.bf16.mxu1 %v984_v44 }
  0x5a   :  { %890 = vmatpush3.bf16.msra.mxu1 %v956_v7 }
 0x106   :  { %v808_v8 = vpop.f32.mrb[0].mxu0 }
 0x107   :  { %v809_v10 = vpop.f32.mrb[1].mxu0 }
 0x108   :  { %v810_v11 = vadd.f32 %v809_v10, %v808_v8  ;;  %v811_v12 = vpop.f32.mrb[2].mxu0  ;;  %v830_v13 = vpop.f32.mrb[0].mxu1 }
 0x109   :  { %v812_v14 = vpop.f32.mrb[3].mxu0  ;;  %v831_v16 = vpop.f32.mrb[1].mxu1 }
 0x10a   :  { %v487_v15 = vadd.f32 %v810_v11, %v732_v9  ;;  %v832_v17 = vadd.f32 %v831_v16, %v830_v13  ;;  %v833_v18 = vpop.f32.mrb[2].mxu1 }
 0x10b   :  { %v834_v19 = vpop.f32.mrb[3].mxu1 }
 0x10c   :  { %v527_v20 = vadd.f32 %v832_v17, %v487_v15 }
 0x110   :  { %v606_v21 = vpop.f32.mrb[4].mxu1 }
 0x111   :  { %v873_v22 = vpop.f32.mrb[5].mxu1 }
 0x112   :  { %v609_v23 = vpop.f32.mrb[6].mxu1 }
 0x113   :  { %v874_v24 = vpop.f32.mrb[7].mxu1 }
 0x126   :  { %v852_v25 = vpop.f32.mrb[4].mxu0 }
 0x127   :  { %v853_v26 = vpop.f32.mrb[5].mxu0 }
 0x128   :  { %v854_v27 = vadd.f32 %v853_v26, %v852_v25  ;;  %v855_v28 = vpop.f32.mrb[6].mxu0 }
 0x129   :  { %v856_v29 = vpop.f32.mrb[7].mxu0 }
 0x12a   :  { %v567_v30 = vadd.f32 %v854_v27, %v527_v20 }
 0x12c   :  { %v607_v31 = vadd.f32 %v606_v21, %v567_v30 }
 0x12e   :  { %v612_v32 = vmax.f32 %v607_v31, 0.0 }
 0x130   :  { %v613_v33 = vpack.c.bf16 %v612_v32, %v612_v32 }
 0x132   :  { %892 = vmatmul.mubr.bf16.vlgmr.msra.gmra.mrb[8].mxu1 %v613_v33 }
 0x205   :  { %v719_v35 = vpop.f32.mrb[8].mxu1 }
 0x206   :  { %v720_v36 = vadd.f32 %v783_v34, %v719_v35  ;;  %v893_v37 = vpop.f32.mrb[9].mxu1 }
 0x207   :  { %v722_v38 = vpop.f32.mrb[10].mxu1 }
 0x208   :  { %v725_v39 = vpack.c.bf16 %v720_v36, %v720_v36  ;;  %v894_v40 = vpop.f32.mrb[11].mxu1 }
 0x20a   :  { %726 = vst [vmem:[%s1100_s5] sm:$0xf] %v725_v39 }
 0x20b   :  { %731 = vsyncpa [#allocation3], 1 }

</bundles_post_ra>
